<compile_context>
chip_gen: v7x
topology: tpu7x:2x2x1
jax: 0.10.0
libtpu: 0.0.40
codegen_flags: <defaults>
</compile_context>

<pallas_src>
import math

import jax
import jax.numpy as jnp
from jax import lax
from jax.experimental import pallas as pl
from jax.experimental.pallas import tpu as pltpu


# --------------------------- kernels ---------------------------

def _dense_bias_kernel(x_ref, w_ref, bias_ref, o_ref, acc_ref):
    """out = x @ W + bias, K-tiled with a persistent f32 accumulator."""
    k = pl.program_id(2)
    part = jnp.dot(x_ref[...], w_ref[...], preferred_element_type=jnp.float32)

    @pl.when(k == 0)
    def _():
        acc_ref[...] = part + bias_ref[...]          # bias folded into init

    @pl.when(k > 0)
    def _():
        acc_ref[...] += part                         # single RMW per step

    @pl.when(k == pl.num_programs(2) - 1)
    def _():
        o_ref[...] = acc_ref[...].astype(o_ref.dtype)


def _gated_linear_kernel(x_ref, w_ref, bias_ref, h_ref, wbg_ref, o_ref, acc_ref):
    """out = x @ W_base^T + b + ((x @ W_A^T) * gate) @ W_B^T.

    H = x @ W_A^T is precomputed in the wrapper (gate folded into W_B), so the
    only extra MXU work here is ONE rank-wide matmul per output tile, issued in
    the k == last epilogue instead of every (j, k) step.
    """
    k = pl.program_id(2)
    part = jnp.dot(x_ref[...], w_ref[...], preferred_element_type=jnp.float32)

    @pl.when(k == 0)
    def _():
        acc_ref[...] = part + bias_ref[...]

    @pl.when(k > 0)
    def _():
        acc_ref[...] += part

    @pl.when(k == pl.num_programs(2) - 1)
    def _():
        lora = jnp.dot(h_ref[...], wbg_ref[...], preferred_element_type=jnp.float32)
        o_ref[...] = (acc_ref[...] + lora).astype(o_ref.dtype)


# --------------------------- wrapper ---------------------------

def _round_up(x, m):
    return ((x + m - 1) // m) * m


def _choose_tile(dim, target, unit=128):
    """Return (tile, padded_dim).

    Prefer the largest `unit` multiple <= target that divides dim; if no such
    divisor exists, PAD the dimension to a multiple of the target tile instead
    of falling back to the full (possibly huge) dimension.
    """
    if dim <= target:
        return dim, dim
    t = max((target // unit) * unit, unit)
    cand = t
    while cand >= unit:
        if dim % cand == 0:
            return cand, dim
        cand -= unit
    return t, _round_up(dim, t)


def _vmem_limit_bytes(tm, tn, tk, rmoe, cdt_bytes, out_bytes, lora_active):
    est = 2 * (tm * tk + tk * tn) * cdt_bytes      # x / W tiles, double-buffered
    est += 2 * tn * 4                              # bias tile (f32)
    est += 2 * tm * tn * out_bytes                 # output tile, double-buffered
    est += tm * tn * 4                             # f32 accumulator scratch
    if lora_active:
        est += 2 * (tm * rmoe + rmoe * tn) * cdt_bytes
    # Headroom, but stay well within v7x's 64 MiB physical VMEM.
    return int(min(48 * 1024 * 1024, max(32 * 1024 * 1024, 2 * est)))


def gated_linear_forward(x, w_base, b_base, w_a, w_b, gate_vec, *,
                         tm=512, tn_target=256, tk_target=1024,
                         compute_dtype=None, merge_lora_into_base=False):
    """x: (B, S, in). Weights in PyTorch convention: w_base (out, in),
    w_a (rmoe, in), w_b (out, rmoe). gate_vec: (rmoe,) expanded_lora_weights,
    or None for the gate_mode == -1 (base-layer-only) path.
    compute_dtype: dtype fed to the MXU (e.g. jnp.bfloat16); accumulation stays f32."""
    orig_dtype = x.dtype
    B, S, in_f = x.shape
    out_f = w_base.shape[0]
    rmoe = w_a.shape[0]
    M = B * S
    cdt = orig_dtype if compute_dtype is None else compute_dtype
    cdt_bytes = jnp.dtype(cdt).itemsize
    out_bytes = jnp.dtype(orig_dtype).itemsize

    lora_active = gate_vec is not None
    if merge_lora_into_base and lora_active:
        # Fast path: fold dW = (W_B * gate) @ W_A into the base weight once
        # (amortized across many calls with a fixed gate) -> plain dense matmul.
        w_base = w_base + (w_b * gate_vec[None, :].astype(w_b.dtype)) @ w_a
        lora_active = False

    # ---- tiling / padding ----
    tm = min(tm, _round_up(M, 8))
    Mpad = _round_up(M, tm)
    tn, Npad = _choose_tile(out_f, tn_target)
    tk, Kpad = _choose_tile(in_f, tk_target)

    # ---- wrapper-side layout + dtype prep (one-time per call, O(out*in)) ----
    x2 = x.reshape(M, in_f)
    x2c = x2.astype(cdt)
    wb_t = w_base.T.astype(cdt)                         # (in, out): canonical matmul layout
    bias2 = b_base.reshape(1, out_f).astype(jnp.float32)

    if Mpad != M or Kpad != in_f:
        x2c = jnp.pad(x2c, ((0, Mpad - M), (0, Kpad - in_f)))
    if Kpad != in_f or Npad != out_f:
        wb_t = jnp.pad(wb_t, ((0, Kpad - in_f), (0, Npad - out_f)))
    if Npad != out_f:
        bias2 = jnp.pad(bias2, ((0, 0), (0, Npad - out_f)))

    grid = (Mpad // tm, Npad // tn, Kpad // tk)
    vmem_limit = _vmem_limit_bytes(tm, tn, tk, rmoe, cdt_bytes, out_bytes, lora_active)
    compiler_params = pltpu.CompilerParams(
        dimension_semantics=("parallel", "parallel", "arbitrary"),
        vmem_limit_bytes=vmem_limit)

    x_spec = pl.BlockSpec((tm, tk), lambda i, j, k: (i, k))
    w_spec = pl.BlockSpec((tk, tn), lambda i, j, k: (k, j))
    b_spec = pl.BlockSpec((1, tn), lambda i, j, k: (0, j))
    o_spec = pl.BlockSpec((tm, tn), lambda i, j, k: (i, j))
    scratch = [pltpu.VMEM((tm, tn), jnp.float32)]

    if lora_active:
        # Precompute H = x @ W_A^T once (tiny: M x rmoe), full-K reduction in f32,
        # cast to the compute dtype exactly once (no per-K-tile rounding).
        h = lax.dot_general(x2.astype(cdt), w_a.astype(cdt), (((1,), (1,)), ((), ())),
                            preferred_element_type=jnp.float32).astype(cdt)
        # Fold the per-rank gate into W_B's columns and pre-transpose to (rmoe, out).
        wbg_t = (w_b * gate_vec[None, :].astype(w_b.dtype)).T.astype(cdt)
        if Mpad != M:
            h = jnp.pad(h, ((0, Mpad - M), (0, 0)))
        if Npad != out_f:
            wbg_t = jnp.pad(wbg_t, ((0, 0), (0, Npad - out_f)))

        out = pl.pallas_call(
            _gated_linear_kernel,
            out_shape=jax.ShapeDtypeStruct((Mpad, Npad), orig_dtype),
            grid_spec=pltpu.PrefetchScalarGridSpec(
                num_scalar_prefetch=0,
                grid=grid,
                in_specs=[
                    x_spec,                                              # x (tm, tk)
                    w_spec,                                              # W_base^T (tk, tn)
                    b_spec,                                              # bias (1, tn), f32
                    pl.BlockSpec((tm, rmoe), lambda i, j, k: (i, 0)),    # H (tm, rmoe)
                    pl.BlockSpec((rmoe, tn), lambda i, j, k: (0, j)),    # gated W_B^T (rmoe, tn)
                ],
                out_specs=o_spec,
                scratch_shapes=scratch,
            ),
            compiler_params=compiler_params,
        )(x2c, wb_t, bias2, h, wbg_t)
    else:
        out = pl.pallas_call(
            _dense_bias_kernel,
            out_shape=jax.ShapeDtypeStruct((Mpad, Npad), orig_dtype),
            grid_spec=pltpu.PrefetchScalarGridSpec(
                num_scalar_prefetch=0,
                grid=grid,
                in_specs=[x_spec, w_spec, b_spec],
                out_specs=o_spec,
                scratch_shapes=scratch,
            ),
            compiler_params=compiler_params,
        )(x2c, wb_t, bias2)

    return out[:M, :out_f].reshape(B, S, out_f)


def build_gate_vector(gate_mode, ranks, scalings, lora_weights=None, dtype=jnp.float32):
    """Glue replicating expanded_lora_weights construction from forward()."""
    rmoe = sum(ranks)
    if gate_mode == -1:
        return None  # base-layer-only path
    if gate_mode == -2:
        assert lora_weights is not None
        parts = [w * s * jnp.ones((r,), dtype=dtype)
                 for w, r, s in zip(lora_weights, ranks, scalings)]
        return jnp.concatenate(parts)
    # gate_mode >= 0: only the selected adapter's rank slice is active
    start = sum(ranks[:gate_mode])
    end = start + ranks[gate_mode]
    vec = jnp.zeros((rmoe,), dtype=dtype)
    vec = vec.at[start:end].set(jnp.asarray(scalings[gate_mode], dtype=dtype))
    return vec


# TODO(synk): lora_dropout is a no-op at inference (p applied only in training) and is
# not modeled; gate_mode == -2 softmax weights are built host-side via build_gate_vector.


if __name__ == "__main__":
    # Small shapes consistent with the module: one adapter of rank r on a
    # Linear(in_features=32, out_features=32) base layer, batch=2, seq=8.
    B, S = 2, 8
    in_features, out_features = 32, 32
    r = 8
    lora_alpha = 1
    ranks = [r]
    scalings = [lora_alpha / math.sqrt(r)]   # use_rslora-style scaling from add_lora
    rmoe = sum(ranks)

    key = jax.random.PRNGKey(0)
    kx, kw, kb, ka, kbl = jax.random.split(key, 5)

    x = jax.random.normal(kx, (B, S, in_features), dtype=jnp.float32)
    # base nn.Linear weight (out, in) + bias
    w_base = jax.random.normal(kw, (out_features, in_features), dtype=jnp.float32) * 0.1
    b_base = jax.random.normal(kb, (out_features,), dtype=jnp.float32) * 0.1
    # lora_A: normal(std=1/r); lora_B: module inits to zeros — use small random
    # values instead so the LoRA path is actually exercised/verified.
    w_a = jax.random.normal(ka, (rmoe, in_features), dtype=jnp.float32) * (1.0 / r)
    w_b = jax.random.normal(kbl, (out_features, rmoe), dtype=jnp.float32) * 0.1

    gate_mode = 0
    gate_vec = build_gate_vector(gate_mode, ranks, scalings, dtype=x.dtype)

    # Pure-JAX reference of the forward semantics.
    ref = x @ w_base.T + b_base
    ref = ref + ((x @ w_a.T) * gate_vec[None, None, :]) @ w_b.T
    ref_base = x @ w_base.T + b_base

    # 1) f32 gated forward.
    out = gated_linear_forward(x, w_base, b_base, w_a, w_b, gate_vec)
    out = jax.block_until_ready(out)
    assert out.shape == (B, S, out_features)
    assert jnp.allclose(out, ref, rtol=2e-2, atol=2e-3), "gated f32 mismatch vs reference"

    # 2) gate_mode == -1 path (base layer only).
    out_base = gated_linear_forward(x, w_base, b_base, w_a, w_b, None)
    out_base = jax.block_until_ready(out_base)
    assert jnp.allclose(out_base, ref_base, rtol=2e-2, atol=2e-3), "base-only mismatch"

    # 3) merged fast path (dW folded into W_base).
    out_merged = gated_linear_forward(x, w_base, b_base, w_a, w_b, gate_vec,
                                      merge_lora_into_base=True)
    out_merged = jax.block_until_ready(out_merged)
    assert jnp.allclose(out_merged, ref, rtol=2e-2, atol=2e-3), "merged-path mismatch"

    # 4) bf16 MXU operands (production setting); loose tolerance vs the f32 reference.
    out_bf16 = gated_linear_forward(x, w_base, b_base, w_a, w_b, gate_vec,
                                    compute_dtype=jnp.bfloat16)
    out_bf16 = jax.block_until_ready(out_bf16)
    assert jnp.allclose(out_bf16, ref, rtol=5e-2, atol=5e-2), "gated bf16 mismatch"

    print("KERNEL_OK")
</pallas_src>

<mosaic_0001>
module attributes {stable_mosaic.version = 11 : i64} {
  func.func @_gated_linear_kernel(%arg0: i32, %arg1: i32, %arg2: i32, %arg3: memref<16x32xf32, #tpu.memory_space<vmem>>, %arg4: memref<32x32xf32, #tpu.memory_space<vmem>>, %arg5: memref<1x32xf32, #tpu.memory_space<vmem>>, %arg6: memref<16x8xf32, #tpu.memory_space<vmem>>, %arg7: memref<8x32xf32, #tpu.memory_space<vmem>>, %arg8: memref<16x32xf32, #tpu.memory_space<vmem>>, %arg9: memref<16x32xf32, #tpu.memory_space<vmem>>) attributes {dimension_semantics = [#tpu.dimension_semantics<parallel>, #tpu.dimension_semantics<parallel>, #tpu.dimension_semantics<arbitrary>], iteration_bounds = array<i64: 1, 1, 1>, scalar_prefetch = 0 : i64, scratch_operands = 1 : i64, tpu.core_type = #tpu.core_type<tc>, window_params = [{transform_indices = @transform_0, window_bounds = array<i64: 16, 32>}, {transform_indices = @transform_1, window_bounds = array<i64: 32, 32>}, {transform_indices = @transform_2, window_bounds = array<i64: 1, 32>}, {transform_indices = @transform_3, window_bounds = array<i64: 16, 8>}, {transform_indices = @transform_4, window_bounds = array<i64: 8, 32>}, {transform_indices = @transform_5, window_bounds = array<i64: 16, 32>}]} {
    %c0 = arith.constant 0 : index
    %c0_0 = arith.constant 0 : index
    %0 = vector.load %arg3[%c0, %c0_0] : memref<16x32xf32, #tpu.memory_space<vmem>>, vector<16x32xf32>
    %c0_1 = arith.constant 0 : index
    %c0_2 = arith.constant 0 : index
    %1 = vector.load %arg4[%c0_1, %c0_2] : memref<32x32xf32, #tpu.memory_space<vmem>>, vector<32x32xf32>
    %cst = arith.constant dense<0.000000e+00> : vector<16x32xf32>
    %2 = tpu.matmul %0, %1, %cst {dimension_numbers = #tpu.dot_dimension_numbers<[1], [0], [0], [1], [0, 0, 1, 1], [], []>} : vector<16x32xf32>, vector<32x32xf32>, vector<16x32xf32> -> vector<16x32xf32>
    %c0_i32 = arith.constant 0 : i32
    %3 = arith.cmpi eq, %arg2, %c0_i32 : i32
    %4 = arith.extui %3 : i1 to i32
    %c0_i32_3 = arith.constant 0 : i32
    %5 = arith.cmpi ne, %4, %c0_i32_3 : i32
    scf.if %5 {
      %c0_8 = arith.constant 0 : index
      %c0_9 = arith.constant 0 : index
      %12 = vector.load %arg5[%c0_8, %c0_9] : memref<1x32xf32, #tpu.memory_space<vmem>>, vector<1x32xf32>
      %13 = vector.broadcast %12 : vector<1x32xf32> to vector<16x32xf32>
      %14 = arith.addf %2, %13 : vector<16x32xf32>
      %c0_10 = arith.constant 0 : index
      %c0_11 = arith.constant 0 : index
      %15 = vector.load %arg9[%c0_10, %c0_11] : memref<16x32xf32, #tpu.memory_space<vmem>>, vector<16x32xf32>
      tpu.vector_store %arg9[%c0_10, %c0_11], %14 {strides = array<i32>} : memref<16x32xf32, #tpu.memory_space<vmem>>, vector<16x32xf32>,
    } else {
    }
    %c0_i32_4 = arith.constant 0 : i32
    %6 = arith.cmpi sgt, %arg2, %c0_i32_4 : i32
    %7 = arith.extui %6 : i1 to i32
    %c0_i32_5 = arith.constant 0 : i32
    %8 = arith.cmpi ne, %7, %c0_i32_5 : i32
    scf.if %8 {
      %c0_8 = arith.constant 0 : index
      %c0_9 = arith.constant 0 : index
      %12 = vector.load %arg9[%c0_8, %c0_9] : memref<16x32xf32, #tpu.memory_space<vmem>>, vector<16x32xf32>
      %13 = arith.addf %12, %2 : vector<16x32xf32>
      %c0_10 = arith.constant 0 : index
      %c0_11 = arith.constant 0 : index
      %14 = vector.load %arg9[%c0_10, %c0_11] : memref<16x32xf32, #tpu.memory_space<vmem>>, vector<16x32xf32>
      tpu.vector_store %arg9[%c0_10, %c0_11], %13 {strides = array<i32>} : memref<16x32xf32, #tpu.memory_space<vmem>>, vector<16x32xf32>,
    } else {
    }
    %c0_i32_6 = arith.constant 0 : i32
    %9 = arith.cmpi eq, %arg2, %c0_i32_6 : i32
    %10 = arith.extui %9 : i1 to i32
    %c0_i32_7 = arith.constant 0 : i32
    %11 = arith.cmpi ne, %10, %c0_i32_7 : i32
    scf.if %11 {
      %c0_8 = arith.constant 0 : index
      %c0_9 = arith.constant 0 : index
      %12 = vector.load %arg6[%c0_8, %c0_9] : memref<16x8xf32, #tpu.memory_space<vmem>>, vector<16x8xf32>
      %c0_10 = arith.constant 0 : index
      %c0_11 = arith.constant 0 : index
      %13 = vector.load %arg7[%c0_10, %c0_11] : memref<8x32xf32, #tpu.memory_space<vmem>>, vector<8x32xf32>
      %cst_12 = arith.constant dense<0.000000e+00> : vector<16x32xf32>
      %14 = tpu.matmul %12, %13, %cst_12 {dimension_numbers = #tpu.dot_dimension_numbers<[1], [0], [0], [1], [0, 0, 1, 1], [], []>} : vector<16x8xf32>, vector<8x32xf32>, vector<16x32xf32> -> vector<16x32xf32>
      %c0_13 = arith.constant 0 : index
      %c0_14 = arith.constant 0 : index
      %15 = vector.load %arg9[%c0_13, %c0_14] : memref<16x32xf32, #tpu.memory_space<vmem>>, vector<16x32xf32>
      %16 = arith.addf %15, %14 : vector<16x32xf32>
      %c0_15 = arith.constant 0 : index
      %c0_16 = arith.constant 0 : index
      %17 = vector.load %arg8[%c0_15, %c0_16] : memref<16x32xf32, #tpu.memory_space<vmem>>, vector<16x32xf32>
      tpu.vector_store %arg8[%c0_15, %c0_16], %16 {strides = array<i32>} : memref<16x32xf32, #tpu.memory_space<vmem>>, vector<16x32xf32>,
    } else {
    }
    return
  }
  func.func @transform_0(%arg0: i32, %arg1: i32, %arg2: i32) -> (i32, i32) {
    %c0_i32 = arith.constant 0 : i32
    return %arg0, %arg2 : i32, i32
  }
  func.func @transform_1(%arg0: i32, %arg1: i32, %arg2: i32) -> (i32, i32) {
    %c0_i32 = arith.constant 0 : i32
    return %arg2, %arg1 : i32, i32
  }
  func.func @transform_2(%arg0: i32, %arg1: i32, %arg2: i32) -> (i32, i32) {
    %c0_i32 = arith.constant 0 : i32
    %c0_i32_0 = arith.constant 0 : i32
    return %c0_i32, %arg1 : i32, i32
  }
  func.func @transform_3(%arg0: i32, %arg1: i32, %arg2: i32) -> (i32, i32) {
    %c0_i32 = arith.constant 0 : i32
    %c0_i32_0 = arith.constant 0 : i32
    return %arg0, %c0_i32 : i32, i32
  }
  func.func @transform_4(%arg0: i32, %arg1: i32, %arg2: i32) -> (i32, i32) {
    %c0_i32 = arith.constant 0 : i32
    %c0_i32_0 = arith.constant 0 : i32
    return %c0_i32, %arg1 : i32, i32
  }
  func.func @transform_5(%arg0: i32, %arg1: i32, %arg2: i32) -> (i32, i32) {
    %c0_i32 = arith.constant 0 : i32
    return %arg0, %arg1 : i32, i32
  }
}

</mosaic_0001>

<bundles_post_ra>
// kernel: tpu_custom_call.1
= control target key start
LH: loop header
LB: loop body
LE: loop exit
PB: predicated region body
PF: predicated region fallthrough
CT: control target
= control target key end

     0   :  { %10 = vsyncpa [#allocation4], 0  ;;  %s437_s0 = inlined_call_operand.vmem [shape: f32[16,32], index: 0, kind: input, shape index: {}]   ;;  %s438_s1 = inlined_call_operand.hbm [shape: f32[32,32], index: 1, kind: input, shape index: {}]   ;;  %s439_s2 = inlined_call_operand.vmem [shape: f32[1,32], index: 2, kind: input, shape index: {}]   ;;  %s440_s3 = inlined_call_operand.vmem [shape: f32[16,8], index: 3, kind: input, shape index: {}]   ;;  %s441_s4 = inlined_call_operand.vmem [shape: f32[8,32], index: 4, kind: input, shape index: {}]   ;;  %s442_s5 = inlined_call_operand.hbm [shape: f32[16,32], index: 5, kind: output, shape index: {}]  }
   0x1   :  { %11 = vsyncpa [#allocation5], 0  ;;  %s349_s18 = smov [#allocation3]   ;;  %s301_s22 = scalar_lea.hbm %s438_s1, 512 }
   0x2   :  { %s19_s19 = sshll.u32 %s349_s18, 4  ;;  %p302_p0 = scmp.ne.s32.totalorder %s438_s1, %s301_s22  ;;  %s20_s19 = int_to_ptr.vmem [resolvable:$true] %s19_s19 }
   0x3   :  { %p305_p1 = scmp.lt.u32.totalorder %s301_s22, %s438_s1 }
   0x5   :  { %p307_p2 = pnand %p305_p1, %p302_p0 }
   0x7   :  { %310 = shalt.err (!%p307_p2)
}
   0x8   :  { %s311_s27 = scalar_lea.vmem %s20_s19, 512  ;;  %p316_p4 = scmp.lt.s32.totalorder %s20_s19, %s20_s19 }
   0x9   :  { %p312_p3 = scmp.ne.s32.totalorder %s20_s19, %s311_s27  ;;  %p317_p5 = scmp.lt.s32.totalorder %s311_s27, %s311_s27 }
   0xb   :  { %p318_p6 = por %p317_p5, %p316_p4 }
   0xd   :  { %p319_p7 = pnand %p318_p6, %p312_p3 }
   0xf   :  { %322 = shalt.err (!%p319_p7)
}
  0x10   :  { %s350_s28 = smov 128   ;;  %s351_s29 = smov 8  }
  0x11   :  { %25 = dma.hbm_to_vmem [thread:$0]  %s438_s1, 512, %s20_s19, [#allocation4], %s350_s28, %s350_s28, %s351_s29  }
  0x12   :  { %345 = dma.done.wait [#allocation4], 512  }
  0x13   :  { %346 = vsyncadd [#allocation4], 4294966784  ;;  %vm41_vm0 = vcmask 261120   ;;  %v37_v0 = vld [vmem:[#allocation3] sm:$0xff]  ;;  %v38_v1 = vld [vmem:[#allocation3 + $0x8] sm:$0xff]  ;;  %vm154_vm1 = vcmask 64512  }
  0x14   :  { %v39_v2 = vld [vmem:[#allocation3 + $0x10] sm:$0xff]  ;;  %v289_v3 = vpack.c.bf16 %v38_v1, %v37_v0  ;;  %v40_v4 = vld [vmem:[#allocation3 + $0x18] sm:$0xff] }
  0x15   :  { %v35_v5 = vld [vmem:[%s437_s0] sm:$0xff]  ;;  %v293_v6 = vpack.c.bf16 %v40_v4, %v39_v2  ;;  %v152_v9 = vld [vmem:[%s440_s3 + $0x8] sm:$0xff] }
  0x16   :  { %281 = vmatprep.mubr.msk.f32.mxu0 %vm41_vm0, %v35_v5  ;;  %v153_v7 = vld [vmem:[%s441_s4] sm:$0xff]  ;;  %290 = vmatprep.subr.bf16.mxu0 %v289_v3  ;;  %v36_v10 = vld [vmem:[%s437_s0 + $0x8] sm:$0xff] }
  0x17   :  { %v151_v8 = vld [vmem:[%s440_s3] sm:$0xff]  ;;  %284 = vmatprep.subr.mxu1 %v153_v7  ;;  %292 = vmatpush3.bf16.msra.mxu0 %v289_v3  ;;  %s352_s3 = smov [#allocation6]  }
  0x18   :  { %285 = vmatpush3.msra.mxu1 %v153_v7  ;;  %294 = vmatprep.subr.bf16.mxu0 %v293_v6  ;;  %v261_v13 = vld [vmem:[%s439_s2] ss:$0 sm:$0xff]  ;;  %s247_s17 = sshll.u32 %s352_s3, 4  ;;  %s248_s17 = int_to_ptr.vmem [resolvable:$true] %s247_s17 }
  0x19   :  { %286 = vmatprep.mubr.msk.f32.mxu1 %vm154_vm1, %v151_v8  ;;  %s323_s0 = scalar_lea.vmem %s248_s17, 256  ;;  %p328_p9 = scmp.lt.s32.totalorder %s248_s17, %s248_s17 }
  0x1a   :  { %287 = vmatmul.mubr.msk.f32.vlgmr.msra.gmra.mrb[0].mxu1 %vm154_vm1, %v152_v9  ;;  %p324_p8 = scmp.ne.s32.totalorder %s248_s17, %s323_s0  ;;  %p329_p10 = scmp.lt.s32.totalorder %s323_s0, %s323_s0 }
  0x1b   :  { %296 = vmatpush3.bf16.msra.mxu0 %v293_v6 }
  0x1c   :  { %p330_p11 = por %p329_p10, %p328_p9 }
  0x1e   :  { %282 = vmatmul.mubr.msk.f32.vlgmr.msra.gmra.mrb[0].mxu0 %vm41_vm0, %v36_v10  ;;  %p331_p12 = pnand %p330_p11, %p324_p8 }
  0xed   :  { %v288_v11 = vpop.f32.mrb[0].mxu1 }
  0xee   :  { %v227_v12 = vpop.f32.mrb[1].mxu1 }
  0xf1   :  { %v283_v14 = vpop.f32.mrb[0].mxu0 }
  0xf2   :  { %v135_v15 = vadd.f32 %v283_v14, %v261_v13  ;;  %v114_v16 = vpop.f32.mrb[1].mxu0 }
  0xf3   :  { %v134_v17 = vadd.f32 %v261_v13, %v114_v16 }
  0xf4   :  { %137 = vst.msk [vmem:[#allocation2 + $0x8] sm:$0xff] %vm41_vm0, %v135_v15 }
  0xf5   :  { %136 = vst.msk [vmem:[#allocation2] sm:$0xff] %vm41_vm0, %v134_v17 }
  0xfb   :  { %v237_v18 = vld [vmem:[#allocation2 + $0x8] sm:$0xff] }
  0xfc   :  { %v239_v19 = vadd.f32 %v288_v11, %v237_v18  ;;  %v236_v20 = vld [vmem:[#allocation2] sm:$0xff] }
  0xfd   :  { %v238_v21 = vadd.f32 %v236_v20, %v227_v12 }
  0xfe   :  { %241 = vst.msk [vmem:[#allocation6 + $0x8] sm:$0xff] %vm41_vm0, %v239_v19 }
  0xff   :  { %240 = vst.msk [vmem:[#allocation6] sm:$0xff] %vm41_vm0, %v238_v21 }
 0x100   :  { %334 = shalt.err (!%p331_p12)
}
 0x101   :  { %s335_s19 = scalar_lea.hbm %s442_s5, 256 }
 0x102   :  { %p336_p13 = scmp.ne.s32.totalorder %s442_s5, %s335_s19  ;;  %p339_p0 = scmp.lt.u32.totalorder %s335_s19, %s442_s5 }
 0x104   :  { %p341_p1 = pnand %p339_p0, %p336_p13 }
 0x106   :  { %344 = shalt.err (!%p341_p1)
}
 0x107   :  { %253 = dma.vmem_to_hbm [thread:$0]  %s248_s17, 256, %s442_s5, [#allocation5], %s350_s28, %s350_s28, %s351_s29  }
 0x108   :  { %347 = dma.done.wait [#allocation5], 256  }
 0x109   :  { %348 = vsyncadd [#allocation5], 4294967040 }
 0x10a   :  { %257 = vsyncpa [#allocation4], 1 }
 0x10b   :  { %258 = vsyncpa [#allocation5], 1 }

</bundles_post_ra>
